<compile_context>
chip_gen: v6e
topology: v6e:2x2x1
jax: 0.10.0
libtpu: 0.0.40
codegen_flags: <defaults>
</compile_context>

<pallas_src>
import functools

import jax
import jax.numpy as jnp
import numpy as np
from jax.experimental import pallas as pl
from jax.experimental.pallas import tpu as pltpu


# ---------------- helpers ----------------
def _round_up(x, m):
    return ((x + m - 1) // m) * m


def _pad2(a, rows, cols):
    return jnp.pad(a, ((0, rows - a.shape[0]), (0, cols - a.shape[1])))


# ---------------- fused Pallas kernel ----------------
def fused_mlp_kernel(x_ref, *refs, use_bf16=False):
    """Whole MLP on one row tile.

    refs = (w0, b0, w1, b1, ..., w_{L-1}, b_{L-1}, o_ref).
    ReLU after every layer except the last (matches nn.Sequential spec).
    """
    o_ref = refs[-1]
    wb_refs = refs[:-1]
    n_layers = len(wb_refs) // 2

    h = x_ref[...]  # (TM, Kp) f32, already in VMEM
    for l in range(n_layers):  # static Python loop -> fully unrolled
        w = wb_refs[2 * l][...]
        b = wb_refs[2 * l + 1][...]
        if use_bf16:
            # bf16 operands, f32 accumulation (v6e/v7x MXU fast path).
            y = jnp.dot(h.astype(jnp.bfloat16), w.astype(jnp.bfloat16),
                        preferred_element_type=jnp.float32)
        else:
            y = jnp.dot(h, w, preferred_element_type=jnp.float32)
        y = y + b
        if l < n_layers - 1:
            y = jnp.maximum(y, 0.0)  # ReLU on the VPU
        h = y
    o_ref[...] = h.astype(o_ref.dtype)


# ---------------- wrapper ----------------
@functools.partial(jax.jit, static_argnames=("tm", "use_bf16"))
def latent_to_modulation_forward(latent, params, *, tm=512, use_bf16=False):
    """latent: (B, latent_dim) f32; params: list of (W(in,out), b(1,out))."""
    B, L = latent.shape
    n_layers = len(params)

    # ---- lane/sublane padding (exact: zero cols/rows contribute nothing) ----
    tm_eff = min(tm, _round_up(B, 8))
    Bp = _round_up(B, tm_eff)
    Lp = _round_up(L, 128)

    x_pad = _pad2(latent, Bp, Lp)

    padded_params = []
    in_p = Lp
    out_dims_p = []
    for (w, b) in params:
        fi, fo = w.shape
        fo_p = _round_up(fo, 128)
        padded_params.append((_pad2(w, in_p, fo_p), _pad2(b, 1, fo_p)))
        out_dims_p.append(fo_p)
        in_p = fo_p
    Mp = out_dims_p[-1]
    num_mod = params[-1][0].shape[1]

    # ---- one fused pallas_call over row tiles ----
    grid = (pl.cdiv(Bp, tm_eff),)

    in_specs = [pl.BlockSpec((tm_eff, Lp), lambda i: (i, 0))]  # x row tile
    operands = [x_pad]
    for (w_p, b_p) in padded_params:
        kp, np_ = w_p.shape
        # Full weight/bias blocks, constant index_map -> resident in VMEM.
        in_specs.append(pl.BlockSpec((kp, np_), lambda i: (0, 0)))
        in_specs.append(pl.BlockSpec((1, np_), lambda i: (0, 0)))
        operands.append(w_p)
        operands.append(b_p)

    kernel = functools.partial(fused_mlp_kernel, use_bf16=use_bf16)
    out_pad = pl.pallas_call(
        kernel,
        out_shape=jax.ShapeDtypeStruct((Bp, Mp), jnp.float32),
        grid=grid,
        in_specs=in_specs,
        out_specs=pl.BlockSpec((tm_eff, Mp), lambda i: (i, 0)),
        compiler_params=pltpu.CompilerParams(
            dimension_semantics=("parallel",),  # shards rows across TCs on v7x
        ),
    )(*operands)

    return out_pad[:B, :num_mod]


# ---------------- parameter init (mirrors nn.Linear default bounds) ----------------
def init_params(key, latent_dim, num_modulations, dim_hidden, num_layers):
    if num_layers == 1:
        dims = [(latent_dim, num_modulations)]
    else:
        dims = [(latent_dim, dim_hidden)]
        dims += [(dim_hidden, dim_hidden)] * (num_layers - 2)
        dims += [(dim_hidden, num_modulations)]
    params = []
    for (fi, fo) in dims:
        key, kw, kb = jax.random.split(key, 3)
        bound = 1.0 / float(np.sqrt(fi))
        w = jax.random.uniform(kw, (fi, fo), jnp.float32, -bound, bound)
        b = jax.random.uniform(kb, (1, fo), jnp.float32, -bound, bound)
        params.append((w, b))
    return params


# ---------------- plain-JAX reference ----------------
def reference_forward(latent, params):
    h = latent
    for i, (w, b) in enumerate(params):
        h = h @ w + b
        if i < len(params) - 1:
            h = jax.nn.relu(h)
    return h


if __name__ == "__main__":
    # Small shapes consistent with LatentToModulation.
    LATENT_DIM = 64
    NUM_MODULATIONS = 96
    DIM_HIDDEN = 128
    NUM_LAYERS = 3
    BATCH = 16

    key = jax.random.PRNGKey(0)
    key, kx, kp = jax.random.split(key, 3)

    latent = jax.random.normal(kx, (BATCH, LATENT_DIM), jnp.float32)
    params = init_params(kp, LATENT_DIM, NUM_MODULATIONS, DIM_HIDDEN, NUM_LAYERS)

    out = latent_to_modulation_forward(latent, params)  # f32 path (exact check)
    out = jax.block_until_ready(out)

    ref = reference_forward(latent, params)
    np.testing.assert_allclose(np.asarray(out), np.asarray(ref), rtol=1e-5, atol=1e-5)
    assert out.shape == (BATCH, NUM_MODULATIONS)

    # Also exercise the num_layers == 1 branch (single Linear).
    params1 = init_params(kp, LATENT_DIM, NUM_MODULATIONS, DIM_HIDDEN, 1)
    out1 = jax.block_until_ready(latent_to_modulation_forward(latent, params1))
    ref1 = reference_forward(latent, params1)
    np.testing.assert_allclose(np.asarray(out1), np.asarray(ref1), rtol=1e-5, atol=1e-5)

    print("KERNEL_OK")
</pallas_src>

<mosaic_0001>
module attributes {stable_mosaic.version = 11 : i64} {
  func.func @fused_mlp_kernel(%arg0: i32, %arg1: memref<16x128xf32, #tpu.memory_space<vmem>>, %arg2: memref<128x128xf32, #tpu.memory_space<vmem>>, %arg3: memref<1x128xf32, #tpu.memory_space<vmem>>, %arg4: memref<128x128xf32, #tpu.memory_space<vmem>>, %arg5: memref<1x128xf32, #tpu.memory_space<vmem>>, %arg6: memref<128x128xf32, #tpu.memory_space<vmem>>, %arg7: memref<1x128xf32, #tpu.memory_space<vmem>>, %arg8: memref<16x128xf32, #tpu.memory_space<vmem>>) attributes {dimension_semantics = [#tpu.dimension_semantics<parallel>], iteration_bounds = array<i64: 1>, scalar_prefetch = 0 : i64, scratch_operands = 0 : i64, tpu.core_type = #tpu.core_type<tc>, window_params = [{transform_indices = @transform_0, window_bounds = array<i64: 16, 128>}, {pipeline_mode = #tpu.pipeline_mode<synchronous>, transform_indices = @transform_1, window_bounds = array<i64: 128, 128>}, {pipeline_mode = #tpu.pipeline_mode<synchronous>, transform_indices = @transform_2, window_bounds = array<i64: 1, 128>}, {pipeline_mode = #tpu.pipeline_mode<synchronous>, transform_indices = @transform_3, window_bounds = array<i64: 128, 128>}, {pipeline_mode = #tpu.pipeline_mode<synchronous>, transform_indices = @transform_4, window_bounds = array<i64: 1, 128>}, {pipeline_mode = #tpu.pipeline_mode<synchronous>, transform_indices = @transform_5, window_bounds = array<i64: 128, 128>}, {pipeline_mode = #tpu.pipeline_mode<synchronous>, transform_indices = @transform_6, window_bounds = array<i64: 1, 128>}, {transform_indices = @transform_7, window_bounds = array<i64: 16, 128>}]} {
    %c0 = arith.constant 0 : index
    %c0_0 = arith.constant 0 : index
    %0 = vector.load %arg1[%c0, %c0_0] : memref<16x128xf32, #tpu.memory_space<vmem>>, vector<16x128xf32>
    %c0_1 = arith.constant 0 : index
    %c0_2 = arith.constant 0 : index
    %1 = vector.load %arg2[%c0_1, %c0_2] : memref<128x128xf32, #tpu.memory_space<vmem>>, vector<128x128xf32>
    %c0_3 = arith.constant 0 : index
    %c0_4 = arith.constant 0 : index
    %2 = vector.load %arg3[%c0_3, %c0_4] : memref<1x128xf32, #tpu.memory_space<vmem>>, vector<1x128xf32>
    %cst = arith.constant dense<0.000000e+00> : vector<16x128xf32>
    %3 = tpu.matmul %0, %1, %cst {dimension_numbers = #tpu.dot_dimension_numbers<[1], [0], [0], [1], [0, 0, 1, 1], [], []>} : vector<16x128xf32>, vector<128x128xf32>, vector<16x128xf32> -> vector<16x128xf32>
    %4 = vector.broadcast %2 : vector<1x128xf32> to vector<16x128xf32>
    %5 = arith.addf %3, %4 : vector<16x128xf32>
    %cst_5 = arith.constant 0.000000e+00 : f32
    %6 = vector.broadcast %cst_5 : f32 to vector<16x128xf32>
    %7 = arith.maximumf %5, %6 : vector<16x128xf32>
    %c0_6 = arith.constant 0 : index
    %c0_7 = arith.constant 0 : index
    %8 = vector.load %arg4[%c0_6, %c0_7] : memref<128x128xf32, #tpu.memory_space<vmem>>, vector<128x128xf32>
    %c0_8 = arith.constant 0 : index
    %c0_9 = arith.constant 0 : index
    %9 = vector.load %arg5[%c0_8, %c0_9] : memref<1x128xf32, #tpu.memory_space<vmem>>, vector<1x128xf32>
    %cst_10 = arith.constant dense<0.000000e+00> : vector<16x128xf32>
    %10 = tpu.matmul %7, %8, %cst_10 {dimension_numbers = #tpu.dot_dimension_numbers<[1], [0], [0], [1], [0, 0, 1, 1], [], []>} : vector<16x128xf32>, vector<128x128xf32>, vector<16x128xf32> -> vector<16x128xf32>
    %11 = vector.broadcast %9 : vector<1x128xf32> to vector<16x128xf32>
    %12 = arith.addf %10, %11 : vector<16x128xf32>
    %cst_11 = arith.constant 0.000000e+00 : f32
    %13 = vector.broadcast %cst_11 : f32 to vector<16x128xf32>
    %14 = arith.maximumf %12, %13 : vector<16x128xf32>
    %c0_12 = arith.constant 0 : index
    %c0_13 = arith.constant 0 : index
    %15 = vector.load %arg6[%c0_12, %c0_13] : memref<128x128xf32, #tpu.memory_space<vmem>>, vector<128x128xf32>
    %c0_14 = arith.constant 0 : index
    %c0_15 = arith.constant 0 : index
    %16 = vector.load %arg7[%c0_14, %c0_15] : memref<1x128xf32, #tpu.memory_space<vmem>>, vector<1x128xf32>
    %cst_16 = arith.constant dense<0.000000e+00> : vector<16x128xf32>
    %17 = tpu.matmul %14, %15, %cst_16 {dimension_numbers = #tpu.dot_dimension_numbers<[1], [0], [0], [1], [0, 0, 1, 1], [], []>} : vector<16x128xf32>, vector<128x128xf32>, vector<16x128xf32> -> vector<16x128xf32>
    %18 = vector.broadcast %16 : vector<1x128xf32> to vector<16x128xf32>
    %19 = arith.addf %17, %18 : vector<16x128xf32>
    %c0_17 = arith.constant 0 : index
    %c0_18 = arith.constant 0 : index
    %20 = vector.load %arg8[%c0_17, %c0_18] : memref<16x128xf32, #tpu.memory_space<vmem>>, vector<16x128xf32>
    tpu.vector_store %arg8[%c0_17, %c0_18], %19 {strides = array<i32>} : memref<16x128xf32, #tpu.memory_space<vmem>>, vector<16x128xf32>,
    return
  }
  func.func @transform_0(%arg0: i32) -> (i32, i32) {
    %c0_i32 = arith.constant 0 : i32
    %c0_i32_0 = arith.constant 0 : i32
    return %arg0, %c0_i32 : i32, i32
  }
  func.func @transform_1(%arg0: i32) -> (i32, i32) {
    %c0_i32 = arith.constant 0 : i32
    %c0_i32_0 = arith.constant 0 : i32
    %c0_i32_1 = arith.constant 0 : i32
    return %c0_i32, %c0_i32_0 : i32, i32
  }
  func.func @transform_2(%arg0: i32) -> (i32, i32) {
    %c0_i32 = arith.constant 0 : i32
    %c0_i32_0 = arith.constant 0 : i32
    %c0_i32_1 = arith.constant 0 : i32
    return %c0_i32, %c0_i32_0 : i32, i32
  }
  func.func @transform_3(%arg0: i32) -> (i32, i32) {
    %c0_i32 = arith.constant 0 : i32
    %c0_i32_0 = arith.constant 0 : i32
    %c0_i32_1 = arith.constant 0 : i32
    return %c0_i32, %c0_i32_0 : i32, i32
  }
  func.func @transform_4(%arg0: i32) -> (i32, i32) {
    %c0_i32 = arith.constant 0 : i32
    %c0_i32_0 = arith.constant 0 : i32
    %c0_i32_1 = arith.constant 0 : i32
    return %c0_i32, %c0_i32_0 : i32, i32
  }
  func.func @transform_5(%arg0: i32) -> (i32, i32) {
    %c0_i32 = arith.constant 0 : i32
    %c0_i32_0 = arith.constant 0 : i32
    %c0_i32_1 = arith.constant 0 : i32
    return %c0_i32, %c0_i32_0 : i32, i32
  }
  func.func @transform_6(%arg0: i32) -> (i32, i32) {
    %c0_i32 = arith.constant 0 : i32
    %c0_i32_0 = arith.constant 0 : i32
    %c0_i32_1 = arith.constant 0 : i32
    return %c0_i32, %c0_i32_0 : i32, i32
  }
  func.func @transform_7(%arg0: i32) -> (i32, i32) {
    %c0_i32 = arith.constant 0 : i32
    %c0_i32_0 = arith.constant 0 : i32
    return %arg0, %c0_i32 : i32, i32
  }
}

</mosaic_0001>

<bundles_post_ra>
// kernel: latent_to_modulation_forward.1
= control target key start
LH: loop header
LB: loop body
LE: loop exit
PB: predicated region body
PF: predicated region fallthrough
CT: control target
= control target key end

     0   :  { %s737_s0 = inlined_call_operand.vmem [shape: f32[16,128], index: 0, kind: input, shape index: {}]   ;;  %s738_s1 = inlined_call_operand.vmem [shape: f32[128,128], index: 1, kind: input, shape index: {}]   ;;  %s739_s2 = inlined_call_operand.vmem [shape: f32[1,128], index: 2, kind: input, shape index: {}]   ;;  %s740_s3 = inlined_call_operand.vmem [shape: f32[128,128], index: 3, kind: input, shape index: {}]   ;;  %s741_s4 = inlined_call_operand.vmem [shape: f32[1,128], index: 4, kind: input, shape index: {}]   ;;  %s742_s5 = inlined_call_operand.vmem [shape: f32[128,128], index: 5, kind: input, shape index: {}]   ;;  %s743_s6 = inlined_call_operand.vmem [shape: f32[1,128], index: 6, kind: input, shape index: {}]   ;;  %s744_s7 = inlined_call_operand.hbm [shape: f32[16,128], index: 7, kind: output, shape index: {}]  }
   0x1   :  { %v44_v0 = vld [vmem:[%s738_s1 + $0x78] sm:$0xff]  ;;  %v43_v1 = vld [vmem:[%s738_s1 + $0x70] sm:$0xff]  ;;  %v42_v2 = vld [vmem:[%s738_s1 + $0x68] sm:$0xff] }
   0x2   :  { %402 = vmatprep.subr.mxu0 %v44_v0  ;;  %v41_v3 = vld [vmem:[%s738_s1 + $0x60] sm:$0xff]  ;;  %v40_v5 = vld [vmem:[%s738_s1 + $0x58] sm:$0xff]  ;;  %v143_v7 = vld [vmem:[%s740_s3 + $0x70] sm:$0xff] }
   0x3   :  { %403 = vmatpush3.msra.mxu0 %v44_v0  ;;  %v27_v4 = vld [vmem:[%s737_s0] sm:$0xff]  ;;  %v144_v6 = vld [vmem:[%s740_s3 + $0x78] sm:$0xff]  ;;  %v39_v8 = vld [vmem:[%s738_s1 + $0x50] sm:$0xff] }
   0x4   :  { %404 = vmatprep.subr.mxu0 %v43_v1  ;;  %434 = vmatprep.mubr.f32.mxu0 %v27_v4  ;;  %v142_v9 = vld [vmem:[%s740_s3 + $0x68] sm:$0xff]  ;;  %v141_v11 = vld [vmem:[%s740_s3 + $0x60] sm:$0xff] }
   0x5   :  { %405 = vmatpush3.msra.mxu0 %v43_v1  ;;  %437 = vmatprep.subr.mxu1 %v144_v6  ;;  %v38_v10 = vld [vmem:[%s738_s1 + $0x48] sm:$0xff] }
   0x6   :  { %406 = vmatprep.subr.mxu0 %v42_v2  ;;  %438 = vmatpush3.msra.mxu1 %v144_v6 }
   0x7   :  { %407 = vmatpush3.msra.mxu0 %v42_v2  ;;  %439 = vmatprep.subr.mxu1 %v143_v7 }
   0x8   :  { %408 = vmatprep.subr.mxu0 %v41_v3  ;;  %440 = vmatpush3.msra.mxu1 %v143_v7 }
   0x9   :  { %409 = vmatpush3.msra.mxu0 %v41_v3 }
   0xa   :  { %410 = vmatprep.subr.mxu0 %v40_v5 }
   0xb   :  { %411 = vmatpush3.msra.mxu0 %v40_v5 }
   0xc   :  { %12 = vsyncpa [#allocation3], 0  ;;  %412 = vmatprep.subr.mxu0 %v39_v8  ;;  %441 = vmatprep.subr.mxu1 %v142_v9  ;;  %v37_v12 = vld [vmem:[%s738_s1 + $0x40] sm:$0xff]  ;;  %v140_v13 = vld [vmem:[%s740_s3 + $0x58] sm:$0xff]  ;;  %s532_s8 = smov [#allocation2]  }
   0xd   :  { %413 = vmatpush3.msra.mxu0 %v39_v8  ;;  %442 = vmatpush3.msra.mxu1 %v142_v9  ;;  %v36_v14 = vld [vmem:[%s738_s1 + $0x38] sm:$0xff]  ;;  %v139_v15 = vld [vmem:[%s740_s3 + $0x50] sm:$0xff]  ;;  %v138_v17 = vld [vmem:[%s740_s3 + $0x48] sm:$0xff] }
   0xe   :  { %414 = vmatprep.subr.mxu0 %v38_v10  ;;  %443 = vmatprep.subr.mxu1 %v141_v11  ;;  %v35_v16 = vld [vmem:[%s738_s1 + $0x30] sm:$0xff]  ;;  %v34_v18 = vld [vmem:[%s738_s1 + $0x28] sm:$0xff]  ;;  %v137_v19 = vld [vmem:[%s740_s3 + $0x40] sm:$0xff] }
   0xf   :  { %415 = vmatpush3.msra.mxu0 %v38_v10  ;;  %444 = vmatpush3.msra.mxu1 %v141_v11  ;;  %v33_v20 = vld [vmem:[%s738_s1 + $0x20] sm:$0xff]  ;;  %v136_v21 = vld [vmem:[%s740_s3 + $0x38] sm:$0xff]  ;;  %v135_v23 = vld [vmem:[%s740_s3 + $0x30] sm:$0xff] }
  0x10   :  { %416 = vmatprep.subr.mxu0 %v37_v12  ;;  %445 = vmatprep.subr.mxu1 %v140_v13  ;;  %v32_v22 = vld [vmem:[%s738_s1 + $0x18] sm:$0xff]  ;;  %v31_v24 = vld [vmem:[%s738_s1 + $0x10] sm:$0xff]  ;;  %v134_v25 = vld [vmem:[%s740_s3 + $0x28] sm:$0xff] }
  0x11   :  { %417 = vmatpush3.msra.mxu0 %v37_v12  ;;  %446 = vmatpush3.msra.mxu1 %v140_v13  ;;  %v30_v26 = vld [vmem:[%s738_s1 + $0x8] sm:$0xff]  ;;  %v133_v27 = vld [vmem:[%s740_s3 + $0x20] sm:$0xff]  ;;  %v132_v30 = vld [vmem:[%s740_s3 + $0x18] sm:$0xff] }
  0x12   :  { %418 = vmatprep.subr.mxu0 %v36_v14  ;;  %447 = vmatprep.subr.mxu1 %v139_v15  ;;  %v29_v28 = vld [vmem:[%s738_s1] sm:$0xff]  ;;  %v28_v29 = vld [vmem:[%s737_s0 + $0x8] sm:$0xff]  ;;  %v131_v31 = vld [vmem:[%s740_s3 + $0x10] sm:$0xff] }
  0x13   :  { %419 = vmatpush3.msra.mxu0 %v36_v14  ;;  %448 = vmatpush3.msra.mxu1 %v139_v15  ;;  %v130_v32 = vld [vmem:[%s740_s3 + $0x8] sm:$0xff]  ;;  %v129_v33 = vld [vmem:[%s740_s3] sm:$0xff]  ;;  %v244_v34 = vld [vmem:[%s742_s5 + $0x78] sm:$0xff] }
  0x14   :  { %420 = vmatprep.subr.mxu0 %v35_v16  ;;  %449 = vmatprep.subr.mxu1 %v138_v17  ;;  %v243_v35 = vld [vmem:[%s742_s5 + $0x70] sm:$0xff]  ;;  %v242_v36 = vld [vmem:[%s742_s5 + $0x68] sm:$0xff]  ;;  %v241_v37 = vld [vmem:[%s742_s5 + $0x60] sm:$0xff] }
  0x15   :  { %421 = vmatpush3.msra.mxu0 %v35_v16  ;;  %450 = vmatpush3.msra.mxu1 %v138_v17  ;;  %v240_v38 = vld [vmem:[%s742_s5 + $0x58] sm:$0xff]  ;;  %v239_v39 = vld [vmem:[%s742_s5 + $0x50] sm:$0xff]  ;;  %v238_v40 = vld [vmem:[%s742_s5 + $0x48] sm:$0xff] }
  0x16   :  { %422 = vmatprep.subr.mxu0 %v34_v18  ;;  %451 = vmatprep.subr.mxu1 %v137_v19  ;;  %v237_v41 = vld [vmem:[%s742_s5 + $0x40] sm:$0xff]  ;;  %v236_v42 = vld [vmem:[%s742_s5 + $0x38] sm:$0xff]  ;;  %v235_v43 = vld [vmem:[%s742_s5 + $0x30] sm:$0xff] }
  0x17   :  { %423 = vmatpush3.msra.mxu0 %v34_v18  ;;  %452 = vmatpush3.msra.mxu1 %v137_v19  ;;  %v234_v44 = vld [vmem:[%s742_s5 + $0x28] sm:$0xff]  ;;  %v233_v45 = vld [vmem:[%s742_s5 + $0x20] sm:$0xff]  ;;  %v232_v53 = vld [vmem:[%s742_s5 + $0x18] sm:$0xff] }
  0x18   :  { %424 = vmatprep.subr.mxu0 %v33_v20  ;;  %453 = vmatprep.subr.mxu1 %v136_v21  ;;  %v345_v46 = vld [vmem:[%s739_s2] ss:$0 sm:$0xff]  ;;  %v231_v54 = vld [vmem:[%s742_s5 + $0x10] sm:$0xff]  ;;  %v230_v55 = vld [vmem:[%s742_s5 + $0x8] sm:$0xff] }
  0x19   :  { %425 = vmatpush3.msra.mxu0 %v33_v20  ;;  %454 = vmatpush3.msra.mxu1 %v136_v21  ;;  %v229_v56 = vld [vmem:[%s742_s5] sm:$0xff]  ;;  %s334_s5 = sshll.u32 %s532_s8, 4  ;;  %s335_s5 = int_to_ptr.vmem [resolvable:$true] %s334_s5 }
  0x1a   :  { %426 = vmatprep.subr.mxu0 %v32_v22  ;;  %455 = vmatprep.subr.mxu1 %v135_v23  ;;  %v346_v57 = vld [vmem:[%s741_s4] ss:$0 sm:$0xff]  ;;  %s510_s4 = scalar_lea.vmem %s335_s5, 256  ;;  %p515_p1 = scmp.lt.s32.totalorder %s335_s5, %s335_s5 }
  0x1b   :  { %427 = vmatpush3.msra.mxu0 %v32_v22  ;;  %456 = vmatpush3.msra.mxu1 %v135_v23  ;;  %v347_v0 = vld [vmem:[%s743_s6] ss:$0 sm:$0xff]  ;;  %p511_p0 = scmp.ne.s32.totalorder %s335_s5, %s510_s4  ;;  %p516_p2 = scmp.lt.s32.totalorder %s510_s4, %s510_s4 }
  0x1c   :  { %428 = vmatprep.subr.mxu0 %v31_v24  ;;  %457 = vmatprep.subr.mxu1 %v134_v25 }
  0x1d   :  { %429 = vmatpush3.msra.mxu0 %v31_v24  ;;  %458 = vmatpush3.msra.mxu1 %v134_v25  ;;  %p517_p3 = por %p516_p2, %p515_p1 }
  0x1e   :  { %430 = vmatprep.subr.mxu0 %v30_v26  ;;  %459 = vmatprep.subr.mxu1 %v133_v27 }
  0x1f   :  { %431 = vmatpush3.msra.mxu0 %v30_v26  ;;  %460 = vmatpush3.msra.mxu1 %v133_v27  ;;  %p518_p4 = pnand %p517_p3, %p511_p0 }
  0x20   :  { %432 = vmatprep.subr.mxu0 %v29_v28  ;;  %461 = vmatprep.subr.mxu1 %v132_v30 }
  0x21   :  { %433 = vmatpush3.msra.mxu0 %v29_v28  ;;  %462 = vmatpush3.msra.mxu1 %v132_v30 }
  0x22   :  { %435 = vmatmul.mubr.f32.vlgmr.msra.gmra.mxu0 %v28_v29  ;;  %463 = vmatprep.subr.mxu1 %v131_v31 }
  0x23   :  { %464 = vmatpush3.msra.mxu1 %v131_v31  ;;  %472 = vmatprep.subr.mxu0 %v244_v34 }
  0x24   :  { %465 = vmatprep.subr.mxu1 %v130_v32  ;;  %473 = vmatpush3.msra.mxu0 %v244_v34 }
  0x25   :  { %466 = vmatpush3.msra.mxu1 %v130_v32  ;;  %474 = vmatprep.subr.mxu0 %v243_v35 }
  0x26   :  { %467 = vmatprep.subr.mxu1 %v129_v33  ;;  %475 = vmatpush3.msra.mxu0 %v243_v35 }
  0x27   :  { %468 = vmatpush3.msra.mxu1 %v129_v33  ;;  %476 = vmatprep.subr.mxu0 %v242_v36 }
  0x28   :  { %477 = vmatpush3.msra.mxu0 %v242_v36 }
  0x29   :  { %478 = vmatprep.subr.mxu0 %v241_v37 }
  0x2a   :  { %479 = vmatpush3.msra.mxu0 %v241_v37 }
  0x2b   :  { %480 = vmatprep.subr.mxu0 %v240_v38 }
  0x2c   :  { %481 = vmatpush3.msra.mxu0 %v240_v38 }
  0x2d   :  { %482 = vmatprep.subr.mxu0 %v239_v39 }
  0x2e   :  { %483 = vmatpush3.msra.mxu0 %v239_v39 }
  0x2f   :  { %484 = vmatprep.subr.mxu0 %v238_v40 }
  0x30   :  { %485 = vmatpush3.msra.mxu0 %v238_v40 }
  0x31   :  { %486 = vmatprep.subr.mxu0 %v237_v41 }
  0x32   :  { %487 = vmatpush3.msra.mxu0 %v237_v41 }
  0x33   :  { %488 = vmatprep.subr.mxu0 %v236_v42 }
  0x34   :  { %489 = vmatpush3.msra.mxu0 %v236_v42 }
  0x35   :  { %490 = vmatprep.subr.mxu0 %v235_v43 }
  0x36   :  { %491 = vmatpush3.msra.mxu0 %v235_v43 }
  0x37   :  { %492 = vmatprep.subr.mxu0 %v234_v44 }
  0x38   :  { %493 = vmatpush3.msra.mxu0 %v234_v44 }
  0x39   :  { %494 = vmatprep.subr.mxu0 %v233_v45 }
  0x3a   :  { %495 = vmatpush3.msra.mxu0 %v233_v45 }
  0x3b   :  { %496 = vmatprep.subr.mxu0 %v232_v53 }
  0x3c   :  { %497 = vmatpush3.msra.mxu0 %v232_v53 }
  0x3d   :  { %498 = vmatprep.subr.mxu0 %v231_v54 }
  0x3e   :  { %499 = vmatpush3.msra.mxu0 %v231_v54 }
  0x3f   :  { %500 = vmatprep.subr.mxu0 %v230_v55 }
  0x40   :  { %501 = vmatpush3.msra.mxu0 %v230_v55 }
  0x41   :  { %502 = vmatprep.subr.mxu0 %v229_v56 }
  0x42   :  { %503 = vmatpush3.msra.mxu0 %v229_v56 }
  0xe2   :  { %v436_v47 = vpop.f32.mrf.mxu0 }
  0xe3   :  { %v124_v48 = vadd.f32 %v436_v47, %v345_v46 }
  0xe4   :  { %v118_v49 = vpop.f32.mrf.mxu0 }
  0xe5   :  { %v119_v50 = vadd.f32 %v345_v46, %v118_v49  ;;  %v128_v52 = vmax.f32 %v124_v48, 0.0 }
  0xe7   :  { %v127_v51 = vmax.f32 %v119_v50, 0.0 }
  0xe9   :  { %469 = vmatprep.mubr.f32.mxu1 %v127_v51 }
  0xea   :  { %470 = vmatmul.mubr.f32.vlgmr.msra.gmra.mxu1 %v128_v52 }
 0x1aa   :  { %v471_v58 = vpop.f32.mrf.mxu1 }
 0x1ab   :  { %v224_v59 = vadd.f32 %v471_v58, %v346_v57 }
 0x1ac   :  { %v218_v60 = vpop.f32.mrf.mxu1 }
 0x1ad   :  { %v219_v61 = vadd.f32 %v346_v57, %v218_v60  ;;  %v228_v63 = vmax.f32 %v224_v59, 0.0 }
 0x1af   :  { %v227_v62 = vmax.f32 %v219_v61, 0.0 }
 0x1b1   :  { %504 = vmatprep.mubr.f32.mxu0 %v227_v62 }
 0x1b2   :  { %505 = vmatmul.mubr.f32.vlgmr.msra.gmra.mxu0 %v228_v63 }
 0x272   :  { %v506_v1 = vpop.f32.mrf.mxu0 }
 0x273   :  { %v324_v2 = vadd.f32 %v506_v1, %v347_v0 }
 0x274   :  { %v318_v3 = vpop.f32.mrf.mxu0 }
 0x275   :  { %328 = vst [vmem:[#allocation2 + $0x8] sm:$0xff] %v324_v2  ;;  %v319_v4 = vadd.f32 %v347_v0, %v318_v3 }
 0x277   :  { %327 = vst [vmem:[#allocation2] sm:$0xff] %v319_v4 }
 0x278   :  { %521 = shalt.err (!%p518_p4)
}
 0x279   :  { %s533_s9 = smov 128   ;;  %s534_s10 = smov 8  }
 0x27a   :  { %340 = dma.vmem_to_hbm [thread:$0]  %s335_s5, 256, %s744_s7, [#allocation3], %s533_s9, %s533_s9, %s534_s10  }
 0x27b   :  { %530 = dma.done.wait [#allocation3], 256  }
 0x27c   :  { %531 = vsyncadd [#allocation3], 4294967040 }
 0x27d   :  { %344 = vsyncpa [#allocation3], 1 }

</bundles_post_ra>
